<compile_context>
chip_gen: v6e
topology: v6e:2x2x1
jax: 0.10.0
libtpu: 0.0.40
codegen_flags: <defaults>
</compile_context>

<pallas_src>
import functools

import jax
import jax.numpy as jnp
from jax.experimental import pallas as pl
from jax.experimental.pallas import tpu as pltpu


# ---------------------------------------------------------------------------
# helpers
# ---------------------------------------------------------------------------
def _round_up(x, m):
    return ((x + m - 1) // m) * m


def _pick_tile(n_p, pref=512):
    """Biggest tile (>=128, multiple of 128) dividing n_p, capped at `pref`."""
    for t in (pref, 256, 128):
        if t <= n_p and n_p % t == 0:
            return t
    return n_p


def _vmem_budget_bytes():
    """Physical VMEM minus headroom for Mosaic internal scratch / pipelining."""
    try:
        cap = int(pltpu.get_tpu_info().vmem_capacity_bytes)
    except Exception:
        cap = 64 << 20  # conservative fallback (v7x-sized)
    return max(cap - (8 << 20), 16 << 20)


def _full_spec(shape):
    # whole-array block resident in VMEM (gridless call: index_map takes no args)
    return pl.BlockSpec(shape, lambda: tuple(0 for _ in shape))


def _masked_log_softmax(h, n_class):
    # log_softmax over the REAL class lanes only (padded lanes masked to -1e30)
    col = jax.lax.broadcasted_iota(jnp.int32, h.shape, h.ndim - 1)
    h = jnp.where(col < n_class, h, jnp.float32(-1e30))
    m = jnp.max(h, axis=-1, keepdims=True)
    lse = jnp.log(jnp.sum(jnp.exp(h - m), axis=-1, keepdims=True)) + m
    return h - lse


# ---------------------------------------------------------------------------
# Fused path: whole forward in ONE pallas_call, everything resident in VMEM
# ---------------------------------------------------------------------------
def _fused_gcn_kernel(adj_ref, embed_ref,
                      head_w_ref, head_b_ref,
                      hid_w_ref, hid_b_ref,
                      tail_w_ref, tail_b_ref,
                      o_ref, *, n_hidden_layers, n_class):
    bf16 = jnp.bfloat16
    adj = adj_ref[...]            # bf16, loaded once, reused by every layer
    hid_w = hid_w_ref[...]        # hoisted out of the layer loop
    hid_b = hid_b_ref[...]        # f32 (1, h_p)

    def gcn_layer(x_bf16, w_bf16, b_f32):
        # relu(adj @ (x @ W + b)) — both matmuls on the MXU, f32 accumulate
        h = jnp.dot(x_bf16, w_bf16, preferred_element_type=jnp.float32) + b_f32
        h = jnp.dot(adj, h.astype(bf16), preferred_element_type=jnp.float32)
        return jnp.maximum(h, 0.0)

    # head layer
    x = gcn_layer(embed_ref[...], head_w_ref[...], head_b_ref[...])

    # hidden layers — activation carried as a value (no scratch round-trip)
    n_rep = n_hidden_layers - 1
    if n_rep > 0:
        if n_rep <= 4:
            for _ in range(n_rep):                       # static unroll (shallow)
                x = gcn_layer(x.astype(bf16), hid_w, hid_b)
        else:                                            # deep: keep code size flat
            x = jax.lax.fori_loop(
                0, n_rep,
                lambda _, xc: gcn_layer(xc.astype(bf16), hid_w, hid_b), x)

    # tail: log_softmax(relu(x @ W + b), axis=-1)
    h = jnp.dot(x.astype(bf16), tail_w_ref[...],
                preferred_element_type=jnp.float32) + tail_b_ref[...]
    h = jnp.maximum(h, 0.0)
    o_ref[...] = _masked_log_softmax(h, n_class)


def _fused_forward(adj_p, embed_p, head_w, head_b, hid_w, hid_b, tail_w, tail_b,
                   n_hidden_layers, n_class, vmem_limit):
    n_p, f_p = embed_p.shape
    h_p = head_w.shape[1]
    c_p = tail_w.shape[1]

    flops = 2 * n_p * f_p * h_p + 2 * n_p * h_p * c_p
    flops += n_hidden_layers * 2 * n_p * n_p * h_p
    flops += (n_hidden_layers - 1) * 2 * n_p * h_p * h_p
    bytes_accessed = (2 * (n_p * n_p + n_p * f_p + f_p * h_p + h_p * h_p + h_p * c_p)
                      + 4 * (2 * h_p + c_p + n_p * c_p))

    kernel = functools.partial(_fused_gcn_kernel,
                               n_hidden_layers=n_hidden_layers, n_class=n_class)
    return pl.pallas_call(
        kernel,
        out_shape=jax.ShapeDtypeStruct((n_p, c_p), jnp.float32),
        in_specs=[_full_spec(adj_p.shape), _full_spec(embed_p.shape),
                  _full_spec(head_w.shape), _full_spec(head_b.shape),
                  _full_spec(hid_w.shape), _full_spec(hid_b.shape),
                  _full_spec(tail_w.shape), _full_spec(tail_b.shape)],
        out_specs=_full_spec((n_p, c_p)),
        compiler_params=pltpu.CompilerParams(vmem_limit_bytes=int(vmem_limit)),
        cost_estimate=pl.CostEstimate(flops=flops,
                                      transcendentals=n_p * c_p + n_p,
                                      bytes_accessed=bytes_accessed),
    )(adj_p, embed_p, head_w, head_b, hid_w, hid_b, tail_w, tail_b)


# ---------------------------------------------------------------------------
# Row-tiled path (large graphs / v7x 64 MiB VMEM): per-layer grid kernels
# ---------------------------------------------------------------------------
def _linear_kernel(x_ref, w_ref, b_ref, o_ref):
    h = jnp.dot(x_ref[...], w_ref[...], preferred_element_type=jnp.float32)
    o_ref[...] = (h + b_ref[...]).astype(o_ref.dtype)


def _linear(x, w, b, tm, budget):
    n_p, d_in = x.shape
    d_out = w.shape[1]
    return pl.pallas_call(
        _linear_kernel,
        out_shape=jax.ShapeDtypeStruct((n_p, d_out), jnp.bfloat16),
        grid=(n_p // tm,),
        in_specs=[pl.BlockSpec((tm, d_in), lambda i: (i, 0)),
                  pl.BlockSpec((d_in, d_out), lambda i: (0, 0)),
                  pl.BlockSpec((1, d_out), lambda i: (0, 0))],
        out_specs=pl.BlockSpec((tm, d_out), lambda i: (i, 0)),
        compiler_params=pltpu.CompilerParams(
            dimension_semantics=("parallel",), vmem_limit_bytes=int(budget)),
    )(x, w, b)


def _spmm_relu_kernel(adj_ref, h_ref, o_ref, acc_ref):
    @pl.when(pl.program_id(1) == 0)
    def _():
        acc_ref[...] = jnp.zeros_like(acc_ref)

    acc_ref[...] += jnp.dot(adj_ref[...], h_ref[...],
                            preferred_element_type=jnp.float32)

    @pl.when(pl.program_id(1) == pl.num_programs(1) - 1)
    def _():
        o_ref[...] = jnp.maximum(acc_ref[...], 0.0).astype(o_ref.dtype)


def _spmm_relu(adj, h, tm, tk, budget):
    n_p = adj.shape[0]
    d = h.shape[1]
    return pl.pallas_call(
        _spmm_relu_kernel,
        out_shape=jax.ShapeDtypeStruct((n_p, d), jnp.bfloat16),
        grid_spec=pltpu.PrefetchScalarGridSpec(
            num_scalar_prefetch=0,
            grid=(n_p // tm, n_p // tk),            # reduction axis last
            in_specs=[pl.BlockSpec((tm, tk), lambda i, k: (i, k)),
                      pl.BlockSpec((tk, d), lambda i, k: (k, 0))],
            out_specs=pl.BlockSpec((tm, d), lambda i, k: (i, 0)),
            scratch_shapes=[pltpu.VMEM((tm, d), jnp.float32)]),
        compiler_params=pltpu.CompilerParams(
            dimension_semantics=("parallel", "arbitrary"),
            vmem_limit_bytes=int(budget)),
    )(adj, h)


def _tail_kernel(x_ref, w_ref, b_ref, o_ref, *, n_class):
    h = jnp.dot(x_ref[...], w_ref[...], preferred_element_type=jnp.float32)
    h = jnp.maximum(h + b_ref[...], 0.0)
    o_ref[...] = _masked_log_softmax(h, n_class)


def _tail(x, w, b, n_class, tm, budget):
    n_p, d_in = x.shape
    c_p = w.shape[1]
    return pl.pallas_call(
        functools.partial(_tail_kernel, n_class=n_class),
        out_shape=jax.ShapeDtypeStruct((n_p, c_p), jnp.float32),
        grid=(n_p // tm,),
        in_specs=[pl.BlockSpec((tm, d_in), lambda i: (i, 0)),
                  pl.BlockSpec((d_in, c_p), lambda i: (0, 0)),
                  pl.BlockSpec((1, c_p), lambda i: (0, 0))],
        out_specs=pl.BlockSpec((tm, c_p), lambda i: (i, 0)),
        compiler_params=pltpu.CompilerParams(
            dimension_semantics=("parallel",), vmem_limit_bytes=int(budget)),
    )(x, w, b)


def _tiled_forward(adj_p, embed_p, head_w, head_b, hid_w, hid_b, tail_w, tail_b,
                   n_hidden_layers, n_class, budget):
    n_p = adj_p.shape[0]
    tm = _pick_tile(n_p)           # >=512 preferred (HBM-roofline friendly)
    tk = tm
    x = _linear(embed_p, head_w, head_b, tm, budget)
    x = _spmm_relu(adj_p, x, tm, tk, budget)
    for _ in range(n_hidden_layers - 1):
        x = _linear(x, hid_w, hid_b, tm, budget)
        x = _spmm_relu(adj_p, x, tm, tk, budget)
    return _tail(x, tail_w, tail_b, n_class, tm, budget)


# ---------------------------------------------------------------------------
# Model wrapper (padding + parameter plumbing = glue, all compute in kernels)
# ---------------------------------------------------------------------------
def init_gcn_params(key, n_feature, n_hidden, n_class):
    """Deterministic torch.nn.Linear-style init; weights stored [out, in]."""
    def linear_init(k, fan_in, fan_out):
        kw, kb = jax.random.split(k)
        bound = 1.0 / jnp.sqrt(jnp.float32(fan_in))
        w = jax.random.uniform(kw, (fan_out, fan_in), jnp.float32, -bound, bound)
        b = jax.random.uniform(kb, (fan_out,), jnp.float32, -bound, bound)
        return w, b

    k1, k2, k3 = jax.random.split(key, 3)
    head_w, head_b = linear_init(k1, n_feature, n_hidden)
    hid_w, hid_b = linear_init(k2, n_hidden, n_hidden)
    tail_w, tail_b = linear_init(k3, n_hidden, n_class)
    return dict(head_w=head_w, head_b=head_b,
                hid_w=hid_w, hid_b=hid_b,
                tail_w=tail_w, tail_b=tail_b)


@functools.partial(jax.jit, static_argnames=("n_hidden_layers", "force_tiled"))
def gcn_spmm_forward(params, adj_dense, embed, n_hidden_layers=1, force_tiled=False):
    """Matches GCN_spMM.forward with graph_sparse_coo densified to adj_dense."""
    n = adj_dense.shape[0]
    n_feature = embed.shape[1]
    n_hidden = params["head_w"].shape[0]
    n_class = params["tail_w"].shape[0]

    # Lane-dense padding: every last dim (including adj's) is a multiple of
    # 128; node count padded to 128 is also a multiple of 16 (bf16 sublanes).
    n_p = _round_up(n, 128)
    f_p = _round_up(n_feature, 128)
    h_p = _round_up(n_hidden, 128)
    c_p = _round_up(n_class, 128)

    bf16, f32 = jnp.bfloat16, jnp.float32
    adj_p = jnp.zeros((n_p, n_p), bf16).at[:n, :n].set(adj_dense.astype(bf16))
    embed_p = jnp.zeros((n_p, f_p), bf16).at[:n, :n_feature].set(embed.astype(bf16))

    def pad_w(w, d_in_p, d_out_p):
        wt = w.T.astype(bf16)                      # torch [out,in] -> [in,out]
        return jnp.zeros((d_in_p, d_out_p), bf16).at[:wt.shape[0], :wt.shape[1]].set(wt)

    def pad_b(b, d_out_p):
        return jnp.zeros((1, d_out_p), f32).at[0, :b.shape[0]].set(b.astype(f32))

    head_w = pad_w(params["head_w"], f_p, h_p)
    head_b = pad_b(params["head_b"], h_p)
    hid_w = pad_w(params["hid_w"], h_p, h_p)
    hid_b = pad_b(params["hid_b"], h_p)
    tail_w = pad_w(params["tail_w"], h_p, c_p)
    tail_b = pad_b(params["tail_b"], c_p)

    budget = _vmem_budget_bytes()

    # resident-footprint estimate for the fused path (bf16 inputs, f32 temps,
    # pessimistically assume Mosaic double-buffers every operand)
    in_bytes = (2 * (n_p * n_p + n_p * f_p + f_p * h_p + h_p * h_p + h_p * c_p)
                + 4 * (2 * h_p + c_p))
    out_bytes = 4 * n_p * c_p
    fused_bytes = 2 * in_bytes + 2 * out_bytes + 3 * 4 * n_p * h_p
    use_fused = (not force_tiled) and (fused_bytes + (4 << 20) <= budget)

    if use_fused:
        vmem_limit = min(max(fused_bytes + (4 << 20), 32 << 20), budget)
        out_p = _fused_forward(adj_p, embed_p, head_w, head_b, hid_w, hid_b,
                               tail_w, tail_b, n_hidden_layers, n_class, vmem_limit)
    else:
        out_p = _tiled_forward(adj_p, embed_p, head_w, head_b, hid_w, hid_b,
                               tail_w, tail_b, n_hidden_layers, n_class, budget)

    return out_p[:n, :n_class]


# ---------------------------------------------------------------------------
# Pure-JAX f32 reference for sanity checking
# ---------------------------------------------------------------------------
def gcn_spmm_reference(params, adj_dense, embed, n_hidden_layers=1):
    x = embed @ params["head_w"].T + params["head_b"]
    x = jnp.maximum(adj_dense @ x, 0.0)
    for _ in range(n_hidden_layers - 1):
        x = x @ params["hid_w"].T + params["hid_b"]
        x = jnp.maximum(adj_dense @ x, 0.0)
    x = jnp.maximum(x @ params["tail_w"].T + params["tail_b"], 0.0)
    return jax.nn.log_softmax(x, axis=-1)


if __name__ == "__main__":
    def make_inputs(key, n_nodes, n_feature, n_hidden, n_class):
        k_param, k_embed, k_adj = jax.random.split(key, 3)
        params = init_gcn_params(k_param, n_feature, n_hidden, n_class)
        embed = jax.random.normal(k_embed, (n_nodes, n_feature), jnp.float32)
        # synthetic sparse graph: random mask + self loops, row-normalized,
        # densified (equivalent to the COO sparse tensor in the torch module)
        mask = (jax.random.uniform(k_adj, (n_nodes, n_nodes)) < 0.3).astype(jnp.float32)
        adj = mask + jnp.eye(n_nodes, dtype=jnp.float32)
        adj = adj / jnp.sum(adj, axis=-1, keepdims=True)
        return params, adj, embed

    key = jax.random.PRNGKey(0)
    k1, k2 = jax.random.split(key)

    # bf16 MXU inputs vs f32 reference -> loosened tolerance (review note).
    ATOL, RTOL = 1e-1, 5e-2

    # Case 1: toy shapes — fused fully-resident single-kernel path.
    params, adj, embed = make_inputs(k1, 8, 16, 32, 8)
    out = jax.block_until_ready(
        gcn_spmm_forward(params, adj, embed, n_hidden_layers=2))
    ref = gcn_spmm_reference(params, adj, embed, n_hidden_layers=2)
    assert out.shape == (8, 8)
    assert jnp.allclose(out, ref, atol=ATOL, rtol=RTOL), "fused path mismatch"

    # Case 2: larger graph forced onto the row-tiled grid path (multi-step
    # K accumulation; parallel row axis -> both TensorCores on v7x).
    params2, adj2, embed2 = make_inputs(k2, 300, 48, 96, 10)
    out_t = jax.block_until_ready(
        gcn_spmm_forward(params2, adj2, embed2, n_hidden_layers=3, force_tiled=True))
    ref2 = gcn_spmm_reference(params2, adj2, embed2, n_hidden_layers=3)
    assert out_t.shape == (300, 10)
    assert jnp.allclose(out_t, ref2, atol=ATOL, rtol=RTOL), "tiled path mismatch"

    # Cross-check: fused path on the same larger case agrees with reference too.
    out_f = jax.block_until_ready(
        gcn_spmm_forward(params2, adj2, embed2, n_hidden_layers=3))
    assert jnp.allclose(out_f, ref2, atol=ATOL, rtol=RTOL), "fused path mismatch (case 2)"

    print("KERNEL_OK")
</pallas_src>

<mosaic_0001>
module attributes {stable_mosaic.version = 11 : i64} {
  func.func @_fused_gcn_kernel(%arg0: memref<128x128xbf16, #tpu.memory_space<vmem>>, %arg1: memref<128x128xbf16, #tpu.memory_space<vmem>>, %arg2: memref<128x128xbf16, #tpu.memory_space<vmem>>, %arg3: memref<1x128xf32, #tpu.memory_space<vmem>>, %arg4: memref<128x128xbf16, #tpu.memory_space<vmem>>, %arg5: memref<1x128xf32, #tpu.memory_space<vmem>>, %arg6: memref<128x128xbf16, #tpu.memory_space<vmem>>, %arg7: memref<1x128xf32, #tpu.memory_space<vmem>>, %arg8: memref<128x128xf32, #tpu.memory_space<vmem>>) attributes {dimension_semantics = [], scalar_prefetch = 0 : i64, scratch_operands = 0 : i64, tpu.core_type = #tpu.core_type<tc>} {
    %c0 = arith.constant 0 : index
    %c0_0 = arith.constant 0 : index
    %0 = vector.load %arg0[%c0, %c0_0] : memref<128x128xbf16, #tpu.memory_space<vmem>>, vector<128x128xbf16>
    %c0_1 = arith.constant 0 : index
    %c0_2 = arith.constant 0 : index
    %1 = vector.load %arg4[%c0_1, %c0_2] : memref<128x128xbf16, #tpu.memory_space<vmem>>, vector<128x128xbf16>
    %c0_3 = arith.constant 0 : index
    %c0_4 = arith.constant 0 : index
    %2 = vector.load %arg5[%c0_3, %c0_4] : memref<1x128xf32, #tpu.memory_space<vmem>>, vector<1x128xf32>
    %c0_5 = arith.constant 0 : index
    %c0_6 = arith.constant 0 : index
    %3 = vector.load %arg1[%c0_5, %c0_6] : memref<128x128xbf16, #tpu.memory_space<vmem>>, vector<128x128xbf16>
    %c0_7 = arith.constant 0 : index
    %c0_8 = arith.constant 0 : index
    %4 = vector.load %arg2[%c0_7, %c0_8] : memref<128x128xbf16, #tpu.memory_space<vmem>>, vector<128x128xbf16>
    %c0_9 = arith.constant 0 : index
    %c0_10 = arith.constant 0 : index
    %5 = vector.load %arg3[%c0_9, %c0_10] : memref<1x128xf32, #tpu.memory_space<vmem>>, vector<1x128xf32>
    %cst = arith.constant dense<0.000000e+00> : vector<128x128xf32>
    %6 = tpu.matmul %3, %4, %cst {dimension_numbers = #tpu.dot_dimension_numbers<[1], [0], [0], [1], [0, 0, 1, 1], [], []>} : vector<128x128xbf16>, vector<128x128xbf16>, vector<128x128xf32> -> vector<128x128xf32>
    %7 = vector.broadcast %5 : vector<1x128xf32> to vector<128x128xf32>
    %8 = arith.addf %6, %7 : vector<128x128xf32>
    %9 = arith.truncf %8 : vector<128x128xf32> to vector<128x128xbf16>
    %cst_11 = arith.constant dense<0.000000e+00> : vector<128x128xf32>
    %10 = tpu.matmul %0, %9, %cst_11 {dimension_numbers = #tpu.dot_dimension_numbers<[1], [0], [0], [1], [0, 0, 1, 1], [], []>} : vector<128x128xbf16>, vector<128x128xbf16>, vector<128x128xf32> -> vector<128x128xf32>
    %cst_12 = arith.constant 0.000000e+00 : f32
    %11 = vector.broadcast %cst_12 : f32 to vector<128x128xf32>
    %12 = arith.maximumf %10, %11 : vector<128x128xf32>
    %13 = arith.truncf %12 : vector<128x128xf32> to vector<128x128xbf16>
    %cst_13 = arith.constant dense<0.000000e+00> : vector<128x128xf32>
    %14 = tpu.matmul %13, %1, %cst_13 {dimension_numbers = #tpu.dot_dimension_numbers<[1], [0], [0], [1], [0, 0, 1, 1], [], []>} : vector<128x128xbf16>, vector<128x128xbf16>, vector<128x128xf32> -> vector<128x128xf32>
    %15 = vector.broadcast %2 : vector<1x128xf32> to vector<128x128xf32>
    %16 = arith.addf %14, %15 : vector<128x128xf32>
    %17 = arith.truncf %16 : vector<128x128xf32> to vector<128x128xbf16>
    %cst_14 = arith.constant dense<0.000000e+00> : vector<128x128xf32>
    %18 = tpu.matmul %0, %17, %cst_14 {dimension_numbers = #tpu.dot_dimension_numbers<[1], [0], [0], [1], [0, 0, 1, 1], [], []>} : vector<128x128xbf16>, vector<128x128xbf16>, vector<128x128xf32> -> vector<128x128xf32>
    %cst_15 = arith.constant 0.000000e+00 : f32
    %19 = vector.broadcast %cst_15 : f32 to vector<128x128xf32>
    %20 = arith.maximumf %18, %19 : vector<128x128xf32>
    %21 = arith.truncf %20 : vector<128x128xf32> to vector<128x128xbf16>
    %c0_16 = arith.constant 0 : index
    %c0_17 = arith.constant 0 : index
    %22 = vector.load %arg6[%c0_16, %c0_17] : memref<128x128xbf16, #tpu.memory_space<vmem>>, vector<128x128xbf16>
    %cst_18 = arith.constant dense<0.000000e+00> : vector<128x128xf32>
    %23 = tpu.matmul %21, %22, %cst_18 {dimension_numbers = #tpu.dot_dimension_numbers<[1], [0], [0], [1], [0, 0, 1, 1], [], []>} : vector<128x128xbf16>, vector<128x128xbf16>, vector<128x128xf32> -> vector<128x128xf32>
    %c0_19 = arith.constant 0 : index
    %c0_20 = arith.constant 0 : index
    %24 = vector.load %arg7[%c0_19, %c0_20] : memref<1x128xf32, #tpu.memory_space<vmem>>, vector<1x128xf32>
    %25 = vector.broadcast %24 : vector<1x128xf32> to vector<128x128xf32>
    %26 = arith.addf %23, %25 : vector<128x128xf32>
    %cst_21 = arith.constant 0.000000e+00 : f32
    %27 = vector.broadcast %cst_21 : f32 to vector<128x128xf32>
    %28 = arith.maximumf %26, %27 : vector<128x128xf32>
    %29 = tpu.iota {dimensions = array<i32: 1>} : vector<128x128xi32>
    %c8_i32 = arith.constant 8 : i32
    %30 = vector.broadcast %c8_i32 : i32 to vector<128x128xi32>
    %31 = arith.cmpi slt, %29, %30 : vector<128x128xi32>
    %cst_22 = arith.constant -1.000000e+30 : f32
    %32 = vector.broadcast %cst_22 : f32 to vector<128x128xf32>
    %33 = arith.select %31, %28, %32 : vector<128x128xi1>, vector<128x128xf32>
    %cst_23 = arith.constant dense<0xFF800000> : vector<128xf32>
    %34 = vector.multi_reduction <maximumf>, %33, %cst_23 [1] : vector<128x128xf32> to vector<128xf32>
    %35 = vector.shape_cast %34 : vector<128xf32> to vector<128x1xf32>
    %36 = vector.broadcast %35 : vector<128x1xf32> to vector<128x128xf32>
    %37 = arith.subf %33, %36 : vector<128x128xf32>
    %38 = math.exp %37 : vector<128x128xf32>
    %cst_24 = arith.constant dense<0.000000e+00> : vector<128xf32>
    %39 = vector.multi_reduction <add>, %38, %cst_24 [1] : vector<128x128xf32> to vector<128xf32>
    %40 = vector.shape_cast %39 : vector<128xf32> to vector<128x1xf32>
    %41 = math.log %40 : vector<128x1xf32>
    %42 = arith.addf %41, %35 : vector<128x1xf32>
    %43 = vector.broadcast %42 : vector<128x1xf32> to vector<128x128xf32>
    %44 = arith.subf %33, %43 : vector<128x128xf32>
    %c0_25 = arith.constant 0 : index
    %c0_26 = arith.constant 0 : index
    %45 = vector.load %arg8[%c0_25, %c0_26] : memref<128x128xf32, #tpu.memory_space<vmem>>, vector<128x128xf32>
    tpu.vector_store %arg8[%c0_25, %c0_26], %44 {strides = array<i32>} : memref<128x128xf32, #tpu.memory_space<vmem>>, vector<128x128xf32>,
    return
  }
}

</mosaic_0001>

<bundles_post_ra>
// kernel: gcn_spmm_forward.1
= control target key start
LH: loop header
LB: loop body
LE: loop exit
PB: predicated region body
PF: predicated region fallthrough
CT: control target
= control target key end

     0   :  { %s2035_s2 = inlined_call_operand.vmem [shape: bf16[128,128], index: 2, kind: input, shape index: {}]   ;;  %s2036_s1 = inlined_call_operand.vmem [shape: bf16[128,128], index: 1, kind: input, shape index: {}]   ;;  %s2037_s0 = inlined_call_operand.vmem [shape: bf16[128,128], index: 0, kind: input, shape index: {}]   ;;  %s2038_s4 = inlined_call_operand.vmem [shape: bf16[128,128], index: 4, kind: input, shape index: {}]   ;;  %s2039_s3 = inlined_call_operand.vmem [shape: f32[1,128], index: 3, kind: input, shape index: {}]   ;;  %s2040_s6 = inlined_call_operand.vmem [shape: bf16[128,128], index: 6, kind: input, shape index: {}]   ;;  %s2041_s5 = inlined_call_operand.vmem [shape: f32[1,128], index: 5, kind: input, shape index: {}]   ;;  %s2042_s7 = inlined_call_operand.vmem [shape: f32[1,128], index: 7, kind: input, shape index: {}]   ;;  %s2043_s8 = inlined_call_operand.vmem [shape: f32[128,128], index: 8, kind: output, shape index: {}]  }
   0x1   :  { %v1450_v0 = vld [vmem:[%s2035_s2 + $0x38] sm:$0xff]   ;;  %v1451_v1 = vld [vmem:[%s2035_s2 + $0x30] sm:$0xff]   ;;  %v1452_v2 = vld [vmem:[%s2035_s2 + $0x28] sm:$0xff]  }
   0x2   :  { %1274 = vmatprep.subr.bf16.mxu0 %v1450_v0  ;;  %v1453_v3 = vld [vmem:[%s2035_s2 + $0x20] sm:$0xff]   ;;  %v1454_v5 = vld [vmem:[%s2035_s2 + $0x18] sm:$0xff]   ;;  %v1455_v6 = vld [vmem:[%s2035_s2 + $0x10] sm:$0xff]  }
   0x3   :  { %1275 = vmatpush3.bf16.msra.mxu0 %v1450_v0  ;;  %v1458_v4 = vld [vmem:[%s2036_s1] sm:$0xff]   ;;  %v1456_v7 = vld [vmem:[%s2035_s2 + $0x8] sm:$0xff]   ;;  %v1460_v10 = vld [vmem:[%s2036_s1 + $0x10] sm:$0xff]  }
   0x4   :  { %1276 = vmatprep.subr.bf16.mxu0 %v1451_v1  ;;  %1290 = vmatprep.mubr.bf16.mxu0 %v1458_v4  ;;  %v1457_v8 = vld [vmem:[%s2035_s2] sm:$0xff]   ;;  %v1459_v9 = vld [vmem:[%s2036_s1 + $0x8] sm:$0xff]   ;;  %v1461_v11 = vld [vmem:[%s2036_s1 + $0x18] sm:$0xff]  }
   0x5   :  { %v1462_v12 = vld [vmem:[%s2036_s1 + $0x20] sm:$0xff]   ;;  %v1463_v13 = vld [vmem:[%s2036_s1 + $0x28] sm:$0xff]   ;;  %v1464_v14 = vld [vmem:[%s2036_s1 + $0x30] sm:$0xff]  }
   0x6   :  { %v1465_v15 = vld [vmem:[%s2036_s1 + $0x38] sm:$0xff]   ;;  %v1650_v16 = vld [vmem:[%s2037_s0] sm:$0xff]   ;;  %v1475_v18 = vld [vmem:[%s2038_s4 + $0x30] sm:$0xff]  }
   0x7   :  { %1277 = vmatpush3.bf16.msra.mxu0 %v1451_v1  ;;  %1322 = vmatprep.mubr.bf16.mxu1 %v1650_v16  ;;  %v1474_v17 = vld [vmem:[%s2038_s4 + $0x38] sm:$0xff]   ;;  %v1476_v19 = vld [vmem:[%s2038_s4 + $0x28] sm:$0xff]   ;;  %v1477_v20 = vld [vmem:[%s2038_s4 + $0x20] sm:$0xff]  }
   0x8   :  { %1278 = vmatprep.subr.bf16.mxu0 %v1452_v2  ;;  %v1478_v21 = vld [vmem:[%s2038_s4 + $0x18] sm:$0xff]   ;;  %v1151_v36 = vld [vmem:[%s2039_s3] ss:$0 sm:$0xff]  ;;  %v1674_v63 = vld [vmem:[%s2037_s0 + $0x8] sm:$0xff]  }
   0x9   :  { %v1679_v0 = vld [vmem:[%s2037_s0 + $0x10] sm:$0xff]   ;;  %v1686_v1 = vld [vmem:[%s2037_s0 + $0x18] sm:$0xff]  }
   0xa   :  { %v1703_v4 = vld [vmem:[%s2037_s0 + $0x30] sm:$0xff]  }
   0xb   :  { %1279 = vmatpush3.bf16.msra.mxu0 %v1452_v2  ;;  %v1691_v2 = vld [vmem:[%s2037_s0 + $0x20] sm:$0xff]  }
   0xc   :  { %1280 = vmatprep.subr.bf16.mxu0 %v1453_v3 }
   0xf   :  { %1281 = vmatpush3.bf16.msra.mxu0 %v1453_v3  ;;  %v1698_v3 = vld [vmem:[%s2037_s0 + $0x28] sm:$0xff]  }
  0x10   :  { %1282 = vmatprep.subr.bf16.mxu0 %v1454_v5 }
  0x13   :  { %1283 = vmatpush3.bf16.msra.mxu0 %v1454_v5  ;;  %v1710_v5 = vld [vmem:[%s2037_s0 + $0x38] sm:$0xff]  }
  0x14   :  { %1284 = vmatprep.subr.bf16.mxu0 %v1455_v6 }
  0x17   :  { %1285 = vmatpush3.bf16.msra.mxu0 %v1455_v6  ;;  %v1479_v6 = vld [vmem:[%s2038_s4 + $0x10] sm:$0xff]  }
  0x18   :  { %1286 = vmatprep.subr.bf16.mxu0 %v1456_v7 }
  0x1b   :  { %1287 = vmatpush3.bf16.msra.mxu0 %v1456_v7  ;;  %v1480_v7 = vld [vmem:[%s2038_s4 + $0x8] sm:$0xff]  }
  0x1c   :  { %1288 = vmatprep.subr.bf16.mxu0 %v1457_v8 }
  0x1f   :  { %1289 = vmatpush3.bf16.msra.mxu0 %v1457_v8  ;;  %v1481_v8 = vld [vmem:[%s2038_s4] sm:$0xff]  }
  0x20   :  { %1338 = vmatprep.subr.bf16.mxu0 %v1474_v17 }
  0x22   :  { %1291 = vmatmul.mubr.bf16.vlgmr.msra.gmra.mxu0 %v1459_v9 }
  0x23   :  { %1294 = vmatprep.mubr.bf16.mxu0 %v1460_v10  ;;  %1339 = vmatpush3.bf16.msra.mxu0 %v1474_v17 }
  0x24   :  { %1340 = vmatprep.subr.bf16.mxu0 %v1475_v18 }
  0x27   :  { %1341 = vmatpush3.bf16.msra.mxu0 %v1475_v18 }
  0x28   :  { %1342 = vmatprep.subr.bf16.mxu0 %v1476_v19 }
  0x2a   :  { %1295 = vmatmul.mubr.bf16.gmra.mxu0 %v1461_v11 }
  0x2b   :  { %1298 = vmatprep.mubr.bf16.mxu0 %v1462_v12  ;;  %1343 = vmatpush3.bf16.msra.mxu0 %v1476_v19 }
  0x2c   :  { %1344 = vmatprep.subr.bf16.mxu0 %v1477_v20 }
  0x2f   :  { %1345 = vmatpush3.bf16.msra.mxu0 %v1477_v20 }
  0x30   :  { %1346 = vmatprep.subr.bf16.mxu0 %v1478_v21 }
  0x32   :  { %1299 = vmatmul.mubr.bf16.gmra.mxu0 %v1463_v13 }
  0x33   :  { %1302 = vmatprep.mubr.bf16.mxu0 %v1464_v14  ;;  %1347 = vmatpush3.bf16.msra.mxu0 %v1478_v21 }
  0x34   :  { %1348 = vmatprep.subr.bf16.mxu0 %v1479_v6 }
  0x37   :  { %1349 = vmatpush3.bf16.msra.mxu0 %v1479_v6 }
  0x38   :  { %1350 = vmatprep.subr.bf16.mxu0 %v1480_v7 }
  0x3a   :  { %1303 = vmatmul.mubr.bf16.gmra.mxu0 %v1465_v15 }
  0x3b   :  { %1351 = vmatpush3.bf16.msra.mxu0 %v1480_v7 }
  0x3c   :  { %1352 = vmatprep.subr.bf16.mxu0 %v1481_v8 }
  0x3f   :  { %1353 = vmatpush3.bf16.msra.mxu0 %v1481_v8 }
  0xe2   :  { %v1292_v22 = vpop.f32.mrf.mxu0 }
  0xe3   :  { %v241_v58 = vadd.f32 %v1292_v22, %v1151_v36 }
  0xe4   :  { %v232_v23 = vpop.f32.mrf.mxu0 }
  0xe5   :  { %v233_v61 = vadd.f32 %v1151_v36, %v232_v23 }
  0xe6   :  { %v1293_v24 = vpop.f32.mrf.mxu0 }
  0xe7   :  { %v244_v56 = vadd.f32 %v1293_v24, %v1151_v36 }
  0xe8   :  { %v235_v25 = vpop.f32.mrf.mxu0 }
  0xe9   :  { %v296_v59 = vpack.c.bf16 %v244_v56, %v241_v58  ;;  %v236_v60 = vadd.f32 %v1151_v36, %v235_v25 }
  0xea   :  { %v1296_v26 = vpop.f32.mrf.mxu0 }
  0xeb   :  { %v257_v52 = vadd.f32 %v1296_v26, %v1151_v36  ;;  %v295_v62 = vpack.c.bf16 %v236_v60, %v233_v61 }
  0xec   :  { %v248_v27 = vpop.f32.mrf.mxu0 }
  0xed   :  { %v249_v55 = vadd.f32 %v1151_v36, %v248_v27 }
  0xee   :  { %v1297_v28 = vpop.f32.mrf.mxu0 }
  0xef   :  { %v260_v50 = vadd.f32 %v1297_v28, %v1151_v36 }
  0xf0   :  { %v251_v29 = vpop.f32.mrf.mxu0 }
  0xf1   :  { %v298_v53 = vpack.c.bf16 %v260_v50, %v257_v52  ;;  %v252_v54 = vadd.f32 %v1151_v36, %v251_v29  ;;  %v1731_v50 = vld [vmem:[%s2040_s6 + $0x30] sm:$0xff]   ;;  %v1746_v52 = vld [vmem:[%s2040_s6 + $0x20] sm:$0xff]  }
  0xf2   :  { %v1300_v30 = vpop.f32.mrf.mxu0 }
  0xf3   :  { %v273_v46 = vadd.f32 %v1300_v30, %v1151_v36  ;;  %v297_v57 = vpack.c.bf16 %v252_v54, %v249_v55 }
  0xf4   :  { %v264_v31 = vpop.f32.mrf.mxu0 }
  0xf5   :  { %v265_v49 = vadd.f32 %v1151_v36, %v264_v31 }
  0xf6   :  { %v1301_v32 = vpop.f32.mrf.mxu0 }
  0xf7   :  { %v276_v44 = vadd.f32 %v1301_v32, %v1151_v36 }
  0xf8   :  { %v267_v33 = vpop.f32.mrf.mxu0 }
  0xf9   :  { %v300_v47 = vpack.c.bf16 %v276_v44, %v273_v46  ;;  %v268_v48 = vadd.f32 %v1151_v36, %v267_v33 }
  0xfa   :  { %v1304_v34 = vpop.f32.mrf.mxu0 }
  0xfb   :  { %v289_v38 = vadd.f32 %v1304_v34, %v1151_v36  ;;  %v299_v51 = vpack.c.bf16 %v268_v48, %v265_v49  ;;  %v1726_v49 = vld [vmem:[%s2040_s6 + $0x38] sm:$0xff]  }
  0xfc   :  { %v280_v35 = vpop.f32.mrf.mxu0  ;;  %1402 = vmatprep.subr.bf16.mxu0 %v1726_v49 }
  0xfd   :  { %v281_v41 = vadd.f32 %v1151_v36, %v280_v35 }
  0xfe   :  { %v1305_v37 = vpop.f32.mrf.mxu0 }
  0xff   :  { %v292_v39 = vadd.f32 %v1305_v37, %v1151_v36 }
 0x100   :  { %v283_v40 = vpop.f32.mrf.mxu0 }
 0x101   :  { %v284_v42 = vadd.f32 %v1151_v36, %v283_v40  ;;  %v302_v43 = vpack.c.bf16 %v292_v39, %v289_v38 }
 0x103   :  { %v301_v45 = vpack.c.bf16 %v284_v42, %v281_v41  ;;  %1306 = vmatprep.subr.bf16.mxu1 %v302_v43 }
 0x104   :  { %1307 = vmatpush3.bf16.msra.mxu1 %v302_v43 }
 0x105   :  { %1308 = vmatprep.subr.bf16.mxu1 %v301_v45 }
 0x108   :  { %1309 = vmatpush3.bf16.msra.mxu1 %v301_v45 }
 0x109   :  { %1310 = vmatprep.subr.bf16.mxu1 %v300_v47 }
 0x10c   :  { %1311 = vmatpush3.bf16.msra.mxu1 %v300_v47 }
 0x10d   :  { %1312 = vmatprep.subr.bf16.mxu1 %v299_v51 }
 0x110   :  { %1313 = vmatpush3.bf16.msra.mxu1 %v299_v51  ;;  %v1739_v51 = vld [vmem:[%s2040_s6 + $0x28] sm:$0xff]  }
 0x111   :  { %1314 = vmatprep.subr.bf16.mxu1 %v298_v53 }
 0x114   :  { %1315 = vmatpush3.bf16.msra.mxu1 %v298_v53  ;;  %v1753_v53 = vld [vmem:[%s2040_s6 + $0x18] sm:$0xff]  }
 0x115   :  { %1316 = vmatprep.subr.bf16.mxu1 %v297_v57 }
 0x118   :  { %1317 = vmatpush3.bf16.msra.mxu1 %v297_v57 }
 0x119   :  { %1318 = vmatprep.subr.bf16.mxu1 %v296_v59 }
 0x11c   :  { %1319 = vmatpush3.bf16.msra.mxu1 %v296_v59 }
 0x11d   :  { %1320 = vmatprep.subr.bf16.mxu1 %v295_v62 }
 0x120   :  { %1321 = vmatpush3.bf16.msra.mxu1 %v295_v62 }
 0x123   :  { %1323 = vmatmul.mubr.bf16.vlgmr.msra.gmra.mxu1 %v1674_v63 }
 0x124   :  { %1326 = vmatprep.mubr.bf16.mxu1 %v1679_v0 }
 0x12b   :  { %1327 = vmatmul.mubr.bf16.gmra.mxu1 %v1686_v1 }
 0x12c   :  { %1330 = vmatprep.mubr.bf16.mxu1 %v1691_v2 }
 0x133   :  { %1331 = vmatmul.mubr.bf16.gmra.mxu1 %v1698_v3 }
 0x134   :  { %1334 = vmatprep.mubr.bf16.mxu1 %v1703_v4 }
 0x13b   :  { %1335 = vmatmul.mubr.bf16.gmra.mxu1 %v1710_v5 }
 0x13c   :  { %1386 = vmatprep.mubr.bf16.mxu1 %v1650_v16 }
 0x1e3   :  { %v1324_v9 = vpop.f32.mrf.mxu1 }
 0x1e4   :  { %v450_v16 = vmax.f32 %v1324_v9, 0.0 }
 0x1e5   :  { %v385_v10 = vpop.f32.mrf.mxu1 }
 0x1e6   :  { %v448_v14 = vmax.f32 %v385_v10, 0.0 }
 0x1e7   :  { %v1325_v11 = vpop.f32.mrf.mxu1 }
 0x1e8   :  { %v451_v12 = vmax.f32 %v1325_v11, 0.0  ;;  %v1176_v11 = vld [vmem:[%s2041_s5] ss:$0 sm:$0xff] }
 0x1e9   :  { %v388_v13 = vpop.f32.mrf.mxu1 }
 0x1ea   :  { %v449_v15 = vmax.f32 %v388_v13, 0.0  ;;  %v465_v19 = vpack.c.bf16 %v451_v12, %v450_v16 }
 0x1eb   :  { %v1328_v17 = vpop.f32.mrf.mxu1 }
 0x1ec   :  { %v464_v18 = vpack.c.bf16 %v449_v15, %v448_v14  ;;  %v454_v26 = vmax.f32 %v1328_v17, 0.0 }
 0x1ed   :  { %v401_v20 = vpop.f32.mrf.mxu1 }
 0x1ee   :  { %1354 = vmatprep.mubr.bf16.mxu0 %v464_v18  ;;  %v452_v24 = vmax.f32 %v401_v20, 0.0 }
 0x1ef   :  { %v1329_v21 = vpop.f32.mrf.mxu1  ;;  %1355 = vmatmul.mubr.bf16.vlgmr.msra.gmra.mxu0 %v465_v19 }
 0x1f0   :  { %v455_v22 = vmax.f32 %v1329_v21, 0.0  ;;  %1403 = vmatpush3.bf16.msra.mxu0 %v1726_v49 }
 0x1f1   :  { %v404_v23 = vpop.f32.mrf.mxu1  ;;  %1404 = vmatprep.subr.bf16.mxu0 %v1731_v50 }
 0x1f2   :  { %v453_v25 = vmax.f32 %v404_v23, 0.0  ;;  %v467_v29 = vpack.c.bf16 %v455_v22, %v454_v26 }
 0x1f3   :  { %v1332_v27 = vpop.f32.mrf.mxu1 }
 0x1f4   :  { %v466_v28 = vpack.c.bf16 %v453_v25, %v452_v24  ;;  %v458_v36 = vmax.f32 %v1332_v27, 0.0  ;;  %1405 = vmatpush3.bf16.msra.mxu0 %v1731_v50 }
 0x1f5   :  { %v417_v30 = vpop.f32.mrf.mxu1  ;;  %1406 = vmatprep.subr.bf16.mxu0 %v1739_v51 }
 0x1f6   :  { %1358 = vmatprep.mubr.bf16.mxu0 %v466_v28  ;;  %v456_v34 = vmax.f32 %v417_v30, 0.0 }
 0x1f7   :  { %v1333_v31 = vpop.f32.mrf.mxu1  ;;  %1359 = vmatmul.mubr.bf16.gmra.mxu0 %v467_v29 }
 0x1f8   :  { %v459_v32 = vmax.f32 %v1333_v31, 0.0  ;;  %1407 = vmatpush3.bf16.msra.mxu0 %v1739_v51 }
 0x1f9   :  { %v420_v33 = vpop.f32.mrf.mxu1  ;;  %1408 = vmatprep.subr.bf16.mxu0 %v1746_v52 }
 0x1fa   :  { %v457_v35 = vmax.f32 %v420_v33, 0.0  ;;  %v469_v39 = vpack.c.bf16 %v459_v32, %v458_v36 }
 0x1fb   :  { %v1336_v37 = vpop.f32.mrf.mxu1 }
 0x1fc   :  { %v468_v38 = vpack.c.bf16 %v457_v35, %v456_v34  ;;  %v462_v46 = vmax.f32 %v1336_v37, 0.0  ;;  %1409 = vmatpush3.bf16.msra.mxu0 %v1746_v52 }
 0x1fd   :  { %v433_v40 = vpop.f32.mrf.mxu1  ;;  %1410 = vmatprep.subr.bf16.mxu0 %v1753_v53 }
 0x1fe   :  { %1362 = vmatprep.mubr.bf16.mxu0 %v468_v38  ;;  %v460_v44 = vmax.f32 %v433_v40, 0.0 }
 0x1ff   :  { %v1337_v41 = vpop.f32.mrf.mxu1  ;;  %1363 = vmatmul.mubr.bf16.gmra.mxu0 %v469_v39 }
 0x200   :  { %v463_v42 = vmax.f32 %v1337_v41, 0.0  ;;  %1411 = vmatpush3.bf16.msra.mxu0 %v1753_v53 }
 0x201   :  { %v436_v43 = vpop.f32.mrf.mxu1 }
 0x202   :  { %v461_v45 = vmax.f32 %v436_v43, 0.0  ;;  %v471_v48 = vpack.c.bf16 %v463_v42, %v462_v46 }
 0x204   :  { %v470_v47 = vpack.c.bf16 %v461_v45, %v460_v44 }
 0x206   :  { %1366 = vmatprep.mubr.bf16.mxu0 %v470_v47 }
 0x207   :  { %1367 = vmatmul.mubr.bf16.gmra.mxu0 %v471_v48 }
 0x2af   :  { %v1356_v54 = vpop.f32.mrf.mxu0 }
 0x2b0   :  { %v569_v33 = vadd.f32 %v1356_v54, %v1176_v11 }
 0x2b1   :  { %v560_v55 = vpop.f32.mrf.mxu0 }
 0x2b2   :  { %v561_v36 = vadd.f32 %v1176_v11, %v560_v55 }
 0x2b3   :  { %v1357_v56 = vpop.f32.mrf.mxu0 }
 0x2b4   :  { %v572_v31 = vadd.f32 %v1357_v56, %v1176_v11 }
 0x2b5   :  { %v563_v57 = vpop.f32.mrf.mxu0 }
 0x2b6   :  { %v624_v34 = vpack.c.bf16 %v572_v31, %v569_v33  ;;  %v564_v35 = vadd.f32 %v1176_v11, %v563_v57 }
 0x2b7   :  { %v1360_v58 = vpop.f32.mrf.mxu0 }
 0x2b8   :  { %v585_v27 = vadd.f32 %v1360_v58, %v1176_v11  ;;  %v623_v37 = vpack.c.bf16 %v564_v35, %v561_v36 }
 0x2b9   :  { %v576_v59 = vpop.f32.mrf.mxu0 }
 0x2ba   :  { %v577_v30 = vadd.f32 %v1176_v11, %v576_v59 }
 0x2bb   :  { %v1361_v60 = vpop.f32.mrf.mxu0 }
 0x2bc   :  { %v588_v25 = vadd.f32 %v1361_v60, %v1176_v11 }
 0x2bd   :  { %v579_v61 = vpop.f32.mrf.mxu0 }
 0x2be   :  { %v626_v28 = vpack.c.bf16 %v588_v25, %v585_v27  ;;  %v580_v29 = vadd.f32 %v1176_v11, %v579_v61 }
 0x2bf   :  { %v1364_v62 = vpop.f32.mrf.mxu0 }
 0x2c0   :  { %v601_v21 = vadd.f32 %v1364_v62, %v1176_v11  ;;  %v625_v32 = vpack.c.bf16 %v580_v29, %v577_v30 }
 0x2c1   :  { %v592_v6 = vpop.f32.mrf.mxu0 }
 0x2c2   :  { %v593_v24 = vadd.f32 %v1176_v11, %v592_v6 }
 0x2c3   :  { %v1365_v7 = vpop.f32.mrf.mxu0 }
 0x2c4   :  { %v604_v19 = vadd.f32 %v1365_v7, %v1176_v11 }
 0x2c5   :  { %v595_v8 = vpop.f32.mrf.mxu0 }
 0x2c6   :  { %v628_v22 = vpack.c.bf16 %v604_v19, %v601_v21  ;;  %v596_v23 = vadd.f32 %v1176_v11, %v595_v8 }
 0x2c7   :  { %v1368_v9 = vpop.f32.mrf.mxu0 }
 0x2c8   :  { %v617_v13 = vadd.f32 %v1368_v9, %v1176_v11  ;;  %v627_v26 = vpack.c.bf16 %v596_v23, %v593_v24 }
 0x2c9   :  { %v608_v10 = vpop.f32.mrf.mxu0 }
 0x2ca   :  { %v609_v16 = vadd.f32 %v1176_v11, %v608_v10 }
 0x2cb   :  { %v1369_v12 = vpop.f32.mrf.mxu0 }
 0x2cc   :  { %v620_v14 = vadd.f32 %v1369_v12, %v1176_v11 }
 0x2cd   :  { %v611_v15 = vpop.f32.mrf.mxu0 }
 0x2ce   :  { %v630_v17 = vpack.c.bf16 %v620_v14, %v617_v13  ;;  %v612_v18 = vadd.f32 %v1176_v11, %v611_v15 }
 0x2d0   :  { %v629_v20 = vpack.c.bf16 %v612_v18, %v609_v16  ;;  %1370 = vmatprep.subr.bf16.mxu1 %v630_v17  ;;  %v1790_v18 = vld [vmem:[%s2042_s7] ss:$0 sm:$0xff] }
 0x2d1   :  { %1371 = vmatpush3.bf16.msra.mxu1 %v630_v17  ;;  %v936_v17 = vlaneseq }
 0x2d2   :  { %1372 = vmatprep.subr.bf16.mxu1 %v629_v20 }
 0x2d3   :  { %v1792_v19 = vand.u32 127, %v936_v17 }
 0x2d5   :  { %1373 = vmatpush3.bf16.msra.mxu1 %v629_v20  ;;  %vm938_vm0 = vcmp.lt.s32.totalorder %v1792_v19, 8 }
 0x2d6   :  { %1374 = vmatprep.subr.bf16.mxu1 %v628_v22 }
 0x2d9   :  { %1375 = vmatpush3.bf16.msra.mxu1 %v628_v22 }
 0x2da   :  { %1376 = vmatprep.subr.bf16.mxu1 %v627_v26 }
 0x2dd   :  { %1377 = vmatpush3.bf16.msra.mxu1 %v627_v26 }
 0x2de   :  { %1378 = vmatprep.subr.bf16.mxu1 %v626_v28 }
 0x2e1   :  { %1379 = vmatpush3.bf16.msra.mxu1 %v626_v28 }
 0x2e2   :  { %1380 = vmatprep.subr.bf16.mxu1 %v625_v32 }
 0x2e5   :  { %1381 = vmatpush3.bf16.msra.mxu1 %v625_v32 }
 0x2e6   :  { %1382 = vmatprep.subr.bf16.mxu1 %v624_v34 }
 0x2e9   :  { %1383 = vmatpush3.bf16.msra.mxu1 %v624_v34 }
 0x2ea   :  { %1384 = vmatprep.subr.bf16.mxu1 %v623_v37 }
 0x2ed   :  { %1385 = vmatpush3.bf16.msra.mxu1 %v623_v37 }
 0x2ee   :  { %1434 = vmatprep.subr.bf16.mxu1 %v1726_v49 }
 0x2f0   :  { %1387 = vmatmul.mubr.bf16.vlgmr.msra.gmra.mxu1 %v1674_v63  ;;  %v1487_v63 = vld [vmem:[%s2040_s6 + $0x10] sm:$0xff]  }
 0x2f1   :  { %1390 = vmatprep.mubr.bf16.mxu1 %v1679_v0  ;;  %1442 = vmatpush3.bf16.msra.mxu1 %v1726_v49  ;;  %v1488_v0 = vld [vmem:[%s2040_s6 + $0x8] sm:$0xff]  }
 0x2f2   :  { %1435 = vmatprep.subr.bf16.mxu1 %v1731_v50  ;;  %1412 = vmatprep.subr.bf16.mxu0 %v1487_v63 }
 0x2f3   :  { %1413 = vmatpush3.bf16.msra.mxu0 %v1487_v63 }
 0x2f4   :  { %1414 = vmatprep.subr.bf16.mxu0 %v1488_v0 }
 0x2f5   :  { %1443 = vmatpush3.bf16.msra.mxu1 %v1731_v50 }
 0x2f6   :  { %1436 = vmatprep.subr.bf16.mxu1 %v1739_v51 }
 0x2f7   :  { %1415 = vmatpush3.bf16.msra.mxu0 %v1488_v0 }
 0x2f8   :  { %1391 = vmatmul.mubr.bf16.gmra.mxu1 %v1686_v1  ;;  %v1489_v1 = vld [vmem:[%s2040_s6] sm:$0xff]  }
 0x2f9   :  { %1394 = vmatprep.mubr.bf16.mxu1 %v1691_v2  ;;  %1444 = vmatpush3.bf16.msra.mxu1 %v1739_v51 }
 0x2fa   :  { %1437 = vmatprep.subr.bf16.mxu1 %v1746_v52  ;;  %1416 = vmatprep.subr.bf16.mxu0 %v1489_v1 }
 0x2fb   :  { %1417 = vmatpush3.bf16.msra.mxu0 %v1489_v1 }
 0x2fd   :  { %1445 = vmatpush3.bf16.msra.mxu1 %v1746_v52 }
 0x2fe   :  { %1438 = vmatprep.subr.bf16.mxu1 %v1753_v53 }
 0x300   :  { %1395 = vmatmul.mubr.bf16.gmra.mxu1 %v1698_v3 }
 0x301   :  { %1398 = vmatprep.mubr.bf16.mxu1 %v1703_v4  ;;  %1446 = vmatpush3.bf16.msra.mxu1 %v1753_v53 }
 0x302   :  { %1439 = vmatprep.subr.bf16.mxu1 %v1487_v63 }
 0x305   :  { %1447 = vmatpush3.bf16.msra.mxu1 %v1487_v63 }
 0x306   :  { %1440 = vmatprep.subr.bf16.mxu1 %v1488_v0 }
 0x308   :  { %1399 = vmatmul.mubr.bf16.gmra.mxu1 %v1710_v5 }
 0x309   :  { %1448 = vmatpush3.bf16.msra.mxu1 %v1488_v0 }
 0x30a   :  { %1441 = vmatprep.subr.bf16.mxu1 %v1489_v1 }
 0x30d   :  { %1449 = vmatpush3.bf16.msra.mxu1 %v1489_v1 }
 0x3b0   :  { %v1388_v2 = vpop.f32.mrf.mxu1 }
 0x3b1   :  { %v730_v41 = vmax.f32 %v1388_v2, 0.0 }
 0x3b2   :  { %v665_v3 = vpop.f32.mrf.mxu1 }
 0x3b3   :  { %v728_v39 = vmax.f32 %v665_v3, 0.0 }
 0x3b4   :  { %v1389_v4 = vpop.f32.mrf.mxu1 }
 0x3b5   :  { %v731_v5 = vmax.f32 %v1389_v4, 0.0 }
 0x3b6   :  { %v668_v38 = vpop.f32.mrf.mxu1 }
 0x3b7   :  { %v729_v40 = vmax.f32 %v668_v38, 0.0  ;;  %v745_v44 = vpack.c.bf16 %v731_v5, %v730_v41 }
 0x3b8   :  { %v1392_v42 = vpop.f32.mrf.mxu1 }
 0x3b9   :  { %v744_v43 = vpack.c.bf16 %v729_v40, %v728_v39  ;;  %v734_v51 = vmax.f32 %v1392_v42, 0.0 }
 0x3ba   :  { %v681_v45 = vpop.f32.mrf.mxu1 }
 0x3bb   :  { %1418 = vmatprep.mubr.bf16.mxu0 %v744_v43  ;;  %v732_v49 = vmax.f32 %v681_v45, 0.0 }
 0x3bc   :  { %v1393_v46 = vpop.f32.mrf.mxu1  ;;  %1419 = vmatmul.mubr.bf16.vlgmr.msra.gmra.mxu0 %v745_v44 }
 0x3bd   :  { %v735_v47 = vmax.f32 %v1393_v46, 0.0 }
 0x3be   :  { %v684_v48 = vpop.f32.mrf.mxu1 }
 0x3bf   :  { %v733_v50 = vmax.f32 %v684_v48, 0.0  ;;  %v747_v54 = vpack.c.bf16 %v735_v47, %v734_v51 }
 0x3c0   :  { %v1396_v52 = vpop.f32.mrf.mxu1 }
 0x3c1   :  { %v746_v53 = vpack.c.bf16 %v733_v50, %v732_v49  ;;  %v738_v61 = vmax.f32 %v1396_v52, 0.0 }
 0x3c2   :  { %v697_v55 = vpop.f32.mrf.mxu1 }
 0x3c3   :  { %1422 = vmatprep.mubr.bf16.mxu0 %v746_v53  ;;  %v736_v59 = vmax.f32 %v697_v55, 0.0 }
 0x3c4   :  { %v1397_v56 = vpop.f32.mrf.mxu1  ;;  %1423 = vmatmul.mubr.bf16.gmra.mxu0 %v747_v54 }
 0x3c5   :  { %v739_v57 = vmax.f32 %v1397_v56, 0.0 }
 0x3c6   :  { %v700_v58 = vpop.f32.mrf.mxu1 }
 0x3c7   :  { %v737_v60 = vmax.f32 %v700_v58, 0.0  ;;  %v749_v7 = vpack.c.bf16 %v739_v57, %v738_v61 }
 0x3c8   :  { %v1400_v62 = vpop.f32.mrf.mxu1 }
 0x3c9   :  { %v748_v6 = vpack.c.bf16 %v737_v60, %v736_v59  ;;  %v742_v14 = vmax.f32 %v1400_v62, 0.0 }
 0x3ca   :  { %v713_v8 = vpop.f32.mrf.mxu1 }
 0x3cb   :  { %1426 = vmatprep.mubr.bf16.mxu1 %v748_v6  ;;  %v740_v12 = vmax.f32 %v713_v8, 0.0 }
 0x3cc   :  { %v1401_v9 = vpop.f32.mrf.mxu1  ;;  %1427 = vmatmul.mubr.bf16.vlgmr.msra.gmra.mxu1 %v749_v7 }
 0x3cd   :  { %v743_v10 = vmax.f32 %v1401_v9, 0.0 }
 0x3ce   :  { %v716_v11 = vpop.f32.mrf.mxu1 }
 0x3cf   :  { %v741_v13 = vmax.f32 %v716_v11, 0.0  ;;  %v751_v16 = vpack.c.bf16 %v743_v10, %v742_v14 }
 0x3d1   :  { %v750_v15 = vpack.c.bf16 %v741_v13, %v740_v12 }
 0x3d3   :  { %1430 = vmatprep.mubr.bf16.mxu1 %v750_v15 }
 0x3d4   :  { %1431 = vmatmul.mubr.bf16.gmra.mxu1 %v751_v16 }
 0x47c   :  { %v1420_v20 = vpop.f32.mrf.mxu0 }
 0x47d   :  { %v866_v21 = vadd.f32 %v1420_v20, %v1790_v18 }
 0x47e   :  { %v857_v22 = vpop.f32.mrf.mxu0 }
 0x47f   :  { %v922_v23 = vmax.f32 %v866_v21, 0.0  ;;  %v858_v24 = vadd.f32 %v1790_v18, %v857_v22 }
 0x480   :  { %v1421_v25 = vpop.f32.mrf.mxu0 }
 0x481   :  { %v920_v26 = vmax.f32 %v858_v24, 0.0  ;;  %v869_v27 = vadd.f32 %v1421_v25, %v1790_v18  ;;  %v1800_v28 = vsel %vm938_vm0, %v922_v23, -1e+30 }
 0x482   :  { %959 = vmax.xlane.f32.xlu1 %v1800_v28  ;;  %v860_v29 = vpop.f32.mrf.mxu0 }
 0x483   :  { %v923_v30 = vmax.f32 %v869_v27, 0.0  ;;  %v861_v31 = vadd.f32 %v1790_v18, %v860_v29  ;;  %v1806_v32 = vsel %vm938_vm0, %v920_v26, -1e+30 }
 0x484   :  { %955 = vmax.xlane.f32.xlu0 %v1806_v32  ;;  %v1424_v33 = vpop.f32.mrf.mxu0 }
 0x485   :  { %v921_v34 = vmax.f32 %v861_v31, 0.0  ;;  %v882_v35 = vadd.f32 %v1424_v33, %v1790_v18  ;;  %v1812_v36 = vsel %vm938_vm0, %v923_v30, -1e+30 }
 0x486   :  { %961 = vmax.xlane.f32.xlu1 %v1812_v36  ;;  %v873_v37 = vpop.f32.mrf.mxu0 }
 0x487   :  { %v926_v63 = vmax.f32 %v882_v35, 0.0  ;;  %v874_v0 = vadd.f32 %v1790_v18, %v873_v37  ;;  %v1818_v1 = vsel %vm938_vm0, %v921_v34, -1e+30 }
 0x488   :  { %957 = vmax.xlane.f32.xlu0 %v1818_v1  ;;  %v1425_v2 = vpop.f32.mrf.mxu0 }
 0x489   :  { %v885_v3 = vadd.f32 %v1425_v2, %v1790_v18  ;;  %v924_v5 = vmax.f32 %v874_v0, 0.0  ;;  %v1825_v40 = vsel %vm938_vm0, %v926_v63, -1e+30 }
 0x48a   :  { %v876_v4 = vpop.f32.mrf.mxu0 }
 0x48b   :  { %v927_v38 = vmax.f32 %v885_v3, 0.0  ;;  %v877_v39 = vadd.f32 %v1790_v18, %v876_v4  ;;  %v1837_v48 = vsel %vm938_vm0, %v924_v5, -1e+30 }
 0x48c   :  { %967 = vmax.xlane.f32.xlu0 %v1825_v40  ;;  %v1428_v41 = vpop.f32.mrf.mxu1 }
 0x48d   :  { %v925_v42 = vmax.f32 %v877_v39, 0.0  ;;  %v898_v43 = vadd.f32 %v1428_v41, %v1790_v18  ;;  %v1831_v44 = vsel %vm938_vm0, %v927_v38, -1e+30 }
 0x48e   :  { %969 = vmax.xlane.f32.xlu1 %v1831_v44  ;;  %v889_v45 = vpop.f32.mrf.mxu1 }
 0x48f   :  { %v930_v46 = vmax.f32 %v898_v43, 0.0  ;;  %v890_v47 = vadd.f32 %v1790_v18, %v889_v45  ;;  %v1843_v51 = vsel %vm938_vm0, %v925_v42, -1e+30 }
 0x490   :  { %963 = vmax.xlane.f32.xlu0 %v1837_v48  ;;  %v1429_v49 = vpop.f32.mrf.mxu1 }
 0x491   :  { %v901_v50 = vadd.f32 %v1429_v49, %v1790_v18  ;;  %v928_v53 = vmax.f32 %v890_v47, 0.0  ;;  %v1849_v56 = vsel %vm938_vm0, %v930_v46, -1e+30 }
 0x492   :  { %965 = vmax.xlane.f32.xlu1 %v1843_v51  ;;  %v892_v52 = vpop.f32.mrf.mxu1 }
 0x493   :  { %v931_v54 = vmax.f32 %v901_v50, 0.0  ;;  %v893_v55 = vadd.f32 %v1790_v18, %v892_v52  ;;  %v1861_v6 = vsel %vm938_vm0, %v928_v53, -1e+30 }
 0x494   :  { %975 = vmax.xlane.f32.xlu0 %v1849_v56  ;;  %v1432_v57 = vpop.f32.mrf.mxu1 }
 0x495   :  { %v929_v58 = vmax.f32 %v893_v55, 0.0  ;;  %v1854_v59 = vsel %vm938_vm0, %v931_v54, -1e+30  ;;  %v914_v61 = vadd.f32 %v1432_v57, %v1790_v18 }
 0x496   :  { %977 = vmax.xlane.f32.xlu1 %v1854_v59  ;;  %v905_v60 = vpop.f32.mrf.mxu1 }
 0x497   :  { %v906_v62 = vadd.f32 %v1790_v18, %v905_v60  ;;  %v1866_v9 = vsel %vm938_vm0, %v929_v58, -1e+30  ;;  %v934_v11 = vmax.f32 %v914_v61, 0.0 }
 0x498   :  { %971 = vmax.xlane.f32.xlu0 %v1861_v6  ;;  %v1433_v7 = vpop.f32.mrf.mxu1 }
 0x499   :  { %v932_v8 = vmax.f32 %v906_v62, 0.0  ;;  %v917_v12 = vadd.f32 %v1433_v7, %v1790_v18  ;;  %v1882_v20 = vsel %vm938_vm0, %v934_v11, -1e+30 }
 0x49a   :  { %973 = vmax.xlane.f32.xlu1 %v1866_v9  ;;  %v908_v10 = vpop.f32.mrf.mxu1 }
 0x49b   :  { %v909_v13 = vadd.f32 %v1790_v18, %v908_v10  ;;  %v1873_v14 = vsel %vm938_vm0, %v932_v8, -1e+30  ;;  %v935_v16 = vmax.f32 %v917_v12, 0.0 }
 0x49c   :  { %979 = vmax.xlane.f32.xlu0 %v1873_v14 }
 0x49d   :  { %v933_v15 = vmax.f32 %v909_v13, 0.0  ;;  %v1888_v18 = vsel %vm938_vm0, %v935_v16, -1e+30 }
 0x49f   :  { %v1878_v17 = vsel %vm938_vm0, %v933_v15, -1e+30 }
 0x4a0   :  { %981 = vmax.xlane.f32.xlu1 %v1878_v17  ;;  %983 = vmax.xlane.f32.xlu0 %v1882_v20 }
 0x4a4   :  { %985 = vmax.xlane.f32.xlu1 %v1888_v18 }
 0x50b   :  { %v1891_v21 = vpop.xlane.xlu1 %959 }
 0x50c   :  { %v989_v22 = vsub.f32 %v1800_v28, %v1891_v21 }
 0x50d   :  { %v1895_v23 = vpop.xlane.xlu0 %955 }
 0x50e   :  { %v1007_v24 = vmul.f32 1.442695, %v989_v22  ;;  %v987_v25 = vsub.f32 %v1806_v32, %v1895_v23 }
 0x50f   :  { %v1899_v26 = vpop.xlane.xlu1 %961 }
 0x510   :  { %1490 = vpow2.f32 %v1007_v24  ;;  %v1003_v27 = vmul.f32 1.442695, %v987_v25  ;;  %v990_v19 = vsub.f32 %v1812_v36, %v1899_v26 }
 0x511   :  { %v1903_v29 = vpop.xlane.xlu0 %957 }
 0x512   :  { %v1009_v30 = vmul.f32 1.442695, %v990_v19  ;;  %v988_v31 = vsub.f32 %v1818_v1, %v1903_v29  ;;  %1492 = vpow2.f32 %v1003_v27 }
 0x514   :  { %1494 = vpow2.f32 %v1009_v30  ;;  %v1005_v33 = vmul.f32 1.442695, %v988_v31 }
 0x515   :  { %v1907_v34 = vpop.xlane.xlu0 %967 }
 0x516   :  { %v993_v35 = vsub.f32 %v1825_v40, %v1907_v34  ;;  %1496 = vpow2.f32 %v1005_v33 }
 0x517   :  { %v1911_v37 = vpop.xlane.xlu1 %969 }
 0x518   :  { %v1015_v63 = vmul.f32 1.442695, %v993_v35  ;;  %v994_v0 = vsub.f32 %v1831_v44, %v1911_v37 }
 0x519   :  { %v1915_v2 = vpop.xlane.xlu0 %963 }
 0x51a   :  { %1498 = vpow2.f32 %v1015_v63  ;;  %v1017_v3 = vmul.f32 1.442695, %v994_v0  ;;  %v991_v4 = vsub.f32 %v1837_v48, %v1915_v2 }
 0x51b   :  { %v1919_v5 = vpop.xlane.xlu1 %965 }
 0x51c   :  { %1500 = vpow2.f32 %v1017_v3  ;;  %v1011_v38 = vmul.f32 1.442695, %v991_v4  ;;  %v992_v39 = vsub.f32 %v1843_v51, %v1919_v5 }
 0x51d   :  { %v1491_v41 = vpop.eup %1490  ;;  %v1923_v42 = vpop.xlane.xlu0 %975 }
 0x51e   :  { %1502 = vpow2.f32 %v1011_v38  ;;  %v1013_v43 = vmul.f32 1.442695, %v992_v39  ;;  %v997_v45 = vsub.f32 %v1849_v56, %v1923_v42  ;;  %1039 = vadd.xlane.f32.xlu0 %v1491_v41 }
 0x51f   :  { %v1927_v46 = vpop.xlane.xlu1 %977  ;;  %v1493_v47 = vpop.eup %1492 }
 0x520   :  { %1504 = vpow2.f32 %v1013_v43  ;;  %v1023_v49 = vmul.f32 1.442695, %v997_v45  ;;  %v998_v50 = vsub.f32 %v1854_v59, %v1927_v46 }
 0x521   :  { %v1495_v52 = vpop.eup %1494  ;;  %v1931_v53 = vpop.xlane.xlu0 %971 }
 0x522   :  { %1506 = vpow2.f32 %v1023_v49  ;;  %v1025_v54 = vmul.f32 1.442695, %v998_v50  ;;  %v995_v55 = vsub.f32 %v1861_v6, %v1931_v53  ;;  %1041 = vadd.xlane.f32.xlu1 %v1495_v52  ;;  %1035 = vadd.xlane.f32.xlu0 %v1493_v47 }
 0x523   :  { %v1935_v57 = vpop.xlane.xlu1 %973  ;;  %v1497_v61 = vpop.eup %1496 }
 0x524   :  { %1508 = vpow2.f32 %v1025_v54  ;;  %v1019_v58 = vmul.f32 1.442695, %v995_v55  ;;  %v996_v60 = vsub.f32 %v1866_v9, %v1935_v57 }
 0x525   :  { %v1939_v62 = vpop.xlane.xlu0 %979 }
 0x526   :  { %1510 = vpow2.f32 %v1019_v58  ;;  %v1021_v7 = vmul.f32 1.442695, %v996_v60  ;;  %v999_v8 = vsub.f32 %v1873_v14, %v1939_v62  ;;  %1037 = vadd.xlane.f32.xlu1 %v1497_v61 }
 0x527   :  { %v1499_v10 = vpop.eup %1498 }
 0x528   :  { %1512 = vpow2.f32 %v1021_v7  ;;  %v1027_v11 = vmul.f32 1.442695, %v999_v8  ;;  %1047 = vadd.xlane.f32.xlu0 %v1499_v10 }
 0x529   :  { %v1501_v12 = vpop.eup %1500  ;;  %v1943_v13 = vpop.xlane.xlu1 %981 }
 0x52a   :  { %v1945_v15 = vpop.xlane.xlu0 %983  ;;  %1514 = vpow2.f32 %v1027_v11  ;;  %v1000_v16 = vsub.f32 %v1878_v17, %v1943_v13  ;;  %1049 = vadd.xlane.f32.xlu1 %v1501_v12 }
 0x52b   :  { %v1001_v22 = vsub.f32 %v1882_v20, %v1945_v15  ;;  %v1503_v24 = vpop.eup %1502 }
 0x52c   :  { %v1029_v25 = vmul.f32 1.442695, %v1000_v16  ;;  %1043 = vadd.xlane.f32.xlu0 %v1503_v24 }
 0x52d   :  { %v1031_v27 = vmul.f32 1.442695, %v1001_v22  ;;  %v1505_v19 = vpop.eup %1504  ;;  %v1951_v30 = vpop.xlane.xlu1 %985 }
 0x52e   :  { %1516 = vpow2.f32 %v1029_v25  ;;  %v1002_v31 = vsub.f32 %v1888_v18, %v1951_v30  ;;  %1045 = vadd.xlane.f32.xlu1 %v1505_v19 }
 0x52f   :  { %v1507_v33 = vpop.eup %1506  ;;  %1518 = vpow2.f32 %v1031_v27 }
 0x530   :  { %v1033_v35 = vmul.f32 1.442695, %v1002_v31  ;;  %1055 = vadd.xlane.f32.xlu0 %v1507_v33 }
 0x531   :  { %v1509_v63 = vpop.eup %1508 }
 0x532   :  { %1520 = vpow2.f32 %v1033_v35  ;;  %1057 = vadd.xlane.f32.xlu1 %v1509_v63 }
 0x533   :  { %v1511_v0 = vpop.eup %1510 }
 0x534   :  { %1051 = vadd.xlane.f32.xlu0 %v1511_v0 }
 0x535   :  { %v1513_v3 = vpop.eup %1512 }
 0x536   :  { %1053 = vadd.xlane.f32.xlu1 %v1513_v3 }
 0x537   :  { %v1515_v4 = vpop.eup %1514 }
 0x538   :  { %1059 = vadd.xlane.f32.xlu0 %v1515_v4 }
 0x53b   :  { %v1517_v38 = vpop.eup %1516 }
 0x53c   :  { %v1519_v39 = vpop.eup %1518  ;;  %1061 = vadd.xlane.f32.xlu1 %v1517_v38 }
 0x53d   :  { %1063 = vadd.xlane.f32.xlu0 %v1519_v39 }
 0x53f   :  { %v1521_v41 = vpop.eup %1520 }
 0x540   :  { %1065 = vadd.xlane.f32.xlu1 %v1521_v41 }
 0x5a7   :  { %v1040_v43 = vpop.xlane.xlu0 %1039 }
 0x5a8   :  { %1522 = vlog2.f32 %v1040_v43 }
 0x5ab   :  { %v1042_v45 = vpop.xlane.xlu1 %1041  ;;  %v1036_v47 = vpop.xlane.xlu0 %1035 }
 0x5ac   :  { %1524 = vlog2.f32 %v1042_v45 }
 0x5ad   :  { %1526 = vlog2.f32 %v1036_v47 }
 0x5af   :  { %v1038_v49 = vpop.xlane.xlu1 %1037 }
 0x5b0   :  { %1528 = vlog2.f32 %v1038_v49 }
 0x5b1   :  { %v1048_v50 = vpop.xlane.xlu0 %1047 }
 0x5b2   :  { %1530 = vlog2.f32 %v1048_v50 }
 0x5b3   :  { %v1050_v52 = vpop.xlane.xlu1 %1049 }
 0x5b4   :  { %1532 = vlog2.f32 %v1050_v52 }
 0x5b5   :  { %v1523_v54 = vpop.eup %1522  ;;  %v1044_v55 = vpop.xlane.xlu0 %1043 }
 0x5b6   :  { %v1072_v58 = vmul.f32 0.6931472, %v1523_v54  ;;  %1534 = vlog2.f32 %v1044_v55 }
 0x5b7   :  { %v1046_v60 = vpop.xlane.xlu1 %1045 }
 0x5b8   :  { %v1101_v61 = vadd.f32 %v1072_v58, %v1891_v21  ;;  %1536 = vlog2.f32 %v1046_v60 }
 0x5b9   :  { %v1525_v7 = vpop.eup %1524  ;;  %v1056_v8 = vpop.xlane.xlu0 %1055 }
 0x5ba   :  { %v1527_v10 = vpop.eup %1526  ;;  %v1117_v11 = vsub.f32 %v1800_v28, %v1101_v61  ;;  %v1074_v12 = vmul.f32 0.6931472, %v1525_v7  ;;  %1538 = vlog2.f32 %v1056_v8 }
 0x5bb   :  { %v1068_v16 = vmul.f32 0.6931472, %v1527_v10  ;;  %v1058_v22 = vpop.xlane.xlu1 %1057 }
 0x5bc   :  { %1133 = vst [vmem:[%s2043_s8 + $0x10] sm:$0xff] %v1117_v11  ;;  %v1102_v24 = vadd.f32 %v1074_v12, %v1899_v26  ;;  %1540 = vlog2.f32 %v1058_v22 }
 0x5bd   :  { %v1529_v25 = vpop.eup %1528  ;;  %v1099_v21 = vadd.f32 %v1068_v16, %v1895_v23  ;;  %v1052_v27 = vpop.xlane.xlu0 %1051 }
 0x5be   :  { %v1118_v19 = vsub.f32 %v1812_v36, %v1102_v24  ;;  %v1070_v31 = vmul.f32 0.6931472, %v1529_v25  ;;  %1542 = vlog2.f32 %v1052_v27 }
 0x5bf   :  { %v1531_v28 = vpop.eup %1530  ;;  %v1115_v33 = vsub.f32 %v1806_v32, %v1099_v21  ;;  %v1054_v35 = vpop.xlane.xlu1 %1053 }
 0x5c0   :  { %1134 = vst [vmem:[%s2043_s8 + $0x18] sm:$0xff] %v1118_v19  ;;  %v1100_v63 = vadd.f32 %v1070_v31, %v1903_v29  ;;  %v1080_v26 = vmul.f32 0.6931472, %v1531_v28  ;;  %1544 = vlog2.f32 %v1054_v35 }
 0x5c1   :  { %v1533_v0 = vpop.eup %1532  ;;  %1131 = vst [vmem:[%s2043_s8] sm:$0xff] %v1115_v33  ;;  %v1060_v36 = vpop.xlane.xlu0 %1059 }
 0x5c2   :  { %v1116_v23 = vsub.f32 %v1818_v1, %v1100_v63  ;;  %v1105_v3 = vadd.f32 %v1080_v26, %v1907_v34  ;;  %v1082_v32 = vmul.f32 0.6931472, %v1533_v0  ;;  %1546 = vlog2.f32 %v1060_v36 }
 0x5c3   :  { %v1535_v4 = vpop.eup %1534 }
 0x5c4   :  { %1132 = vst [vmem:[%s2043_s8 + $0x8] sm:$0xff] %v1116_v23  ;;  %v1121_v29 = vsub.f32 %v1825_v40, %v1105_v3  ;;  %v1106_v38 = vadd.f32 %v1082_v32, %v1911_v37  ;;  %v1076_v39 = vmul.f32 0.6931472, %v1535_v4 }
 0x5c5   :  { %v1537_v41 = vpop.eup %1536  ;;  %v1062_v43 = vpop.xlane.xlu1 %1061 }
 0x5c6   :  { %1137 = vst [vmem:[%s2043_s8 + $0x30] sm:$0xff] %v1121_v29  ;;  %v1122_v1 = vsub.f32 %v1831_v44, %v1106_v38  ;;  %v1103_v34 = vadd.f32 %v1076_v39, %v1915_v2  ;;  %v1078_v45 = vmul.f32 0.6931472, %v1537_v41  ;;  %1548 = vlog2.f32 %v1062_v43  ;;  %v1064_v47 = vpop.xlane.xlu0 %1063 }
 0x5c7   :  { %v1539_v49 = vpop.eup %1538  ;;  %1550 = vlog2.f32 %v1064_v47 }
 0x5c8   :  { %1138 = vst [vmem:[%s2043_s8 + $0x38] sm:$0xff] %v1122_v1  ;;  %v1119_v40 = vsub.f32 %v1837_v48, %v1103_v34  ;;  %v1104_v37 = vadd.f32 %v1078_v45, %v1919_v5  ;;  %v1088_v50 = vmul.f32 0.6931472, %v1539_v49 }
 0x5c9   :  { %v1541_v52 = vpop.eup %1540  ;;  %v1066_v54 = vpop.xlane.xlu1 %1065 }
 0x5ca   :  { %1135 = vst [vmem:[%s2043_s8 + $0x20] sm:$0xff] %v1119_v40  ;;  %v1120_v44 = vsub.f32 %v1843_v51, %v1104_v37  ;;  %v1109_v2 = vadd.f32 %v1088_v50, %v1923_v42  ;;  %v1090_v55 = vmul.f32 0.6931472, %v1541_v52  ;;  %1552 = vlog2.f32 %v1066_v54 }
 0x5cb   :  { %v1543_v58 = vpop.eup %1542 }
 0x5cc   :  { %1136 = vst [vmem:[%s2043_s8 + $0x28] sm:$0xff] %v1120_v44  ;;  %v1125_v48 = vsub.f32 %v1849_v56, %v1109_v2  ;;  %v1110_v5 = vadd.f32 %v1090_v55, %v1927_v46  ;;  %v1084_v60 = vmul.f32 0.6931472, %v1543_v58 }
 0x5cd   :  { %v1545_v61 = vpop.eup %1544 }
 0x5ce   :  { %1141 = vst [vmem:[%s2043_s8 + $0x50] sm:$0xff] %v1125_v48  ;;  %v1126_v51 = vsub.f32 %v1854_v59, %v1110_v5  ;;  %v1107_v42 = vadd.f32 %v1084_v60, %v1931_v53  ;;  %v1086_v7 = vmul.f32 0.6931472, %v1545_v61 }
 0x5cf   :  { %v1547_v8 = vpop.eup %1546 }
 0x5d0   :  { %1142 = vst [vmem:[%s2043_s8 + $0x58] sm:$0xff] %v1126_v51  ;;  %v1123_v56 = vsub.f32 %v1861_v6, %v1107_v42  ;;  %v1108_v46 = vadd.f32 %v1086_v7, %v1935_v57  ;;  %v1092_v10 = vmul.f32 0.6931472, %v1547_v8 }
 0x5d2   :  { %1139 = vst [vmem:[%s2043_s8 + $0x40] sm:$0xff] %v1123_v56  ;;  %v1124_v11 = vsub.f32 %v1866_v9, %v1108_v46  ;;  %v1111_v59 = vadd.f32 %v1092_v10, %v1939_v62 }
 0x5d3   :  { %v1549_v53 = vpop.eup %1548 }
 0x5d4   :  { %v1551_v12 = vpop.eup %1550  ;;  %1140 = vst [vmem:[%s2043_s8 + $0x48] sm:$0xff] %v1124_v11  ;;  %v1127_v16 = vsub.f32 %v1873_v14, %v1111_v59  ;;  %v1094_v6 = vmul.f32 0.6931472, %v1549_v53 }
 0x5d5   :  { %v1096_v22 = vmul.f32 0.6931472, %v1551_v12 }
 0x5d6   :  { %1143 = vst [vmem:[%s2043_s8 + $0x60] sm:$0xff] %v1127_v16  ;;  %v1112_v57 = vadd.f32 %v1094_v6, %v1943_v13 }
 0x5d7   :  { %v1553_v24 = vpop.eup %1552  ;;  %v1113_v9 = vadd.f32 %v1096_v22, %v1945_v15 }
 0x5d8   :  { %v1128_v62 = vsub.f32 %v1878_v17, %v1112_v57  ;;  %v1098_v25 = vmul.f32 0.6931472, %v1553_v24 }
 0x5d9   :  { %v1129_v21 = vsub.f32 %v1882_v20, %v1113_v9 }
 0x5da   :  { %1144 = vst [vmem:[%s2043_s8 + $0x68] sm:$0xff] %v1128_v62  ;;  %v1114_v14 = vadd.f32 %v1098_v25, %v1951_v30 }
 0x5db   :  { %1145 = vst [vmem:[%s2043_s8 + $0x70] sm:$0xff] %v1129_v21 }
 0x5dc   :  { %v1130_v13 = vsub.f32 %v1888_v18, %v1114_v14 }
 0x5de   :  { %1146 = vst [vmem:[%s2043_s8 + $0x78] sm:$0xff] %v1130_v13 }

</bundles_post_ra>
